<compile_context>
chip_gen: v5e
topology: v5e:2x2
jax: 0.10.0
libtpu: 0.0.40
codegen_flags: <defaults>
</compile_context>

<pallas_src>
import math

import jax
import jax.numpy as jnp
from jax import lax
from jax.experimental import pallas as pl
from jax.experimental.pallas import tpu as pltpu

SIGMA_V = 0.1   # std of the noise added to V_j
SIGMA_R = 0.1   # "sigma2_R" in the module, used as the Normal std
DIM = 5         # self.dim


def _round_up(x: int, m: int) -> int:
    return ((x + m - 1) // m) * m


def _kl_block_kernel(u_ref, vj_ref, r_ref, c_ref, out_ref):
    # u_ref  : (TN, K)  bf16/f32 -- U-embedding rows for this N tile
    # vj_ref : (J, K)   bf16/f32 -- V_j matrix (constant across the grid)
    # r_ref  : (TN, J)  f32      -- responses R (zero on padded rows)
    # c_ref  : (TN, J)  int8     -- mask (C == 1), zero on padded rows
    # out_ref: (1, 8, 128) f32   -- per-block partial sum of mask*(R - sigmoid(U_emb @ V_j^T))^2

    # Hot matmul on the MXU: contract K -> (TN, J), f32 accumulation.
    s = lax.dot_general(u_ref[...], vj_ref[...],
                        (((1,), (1,)), ((), ())),
                        preferred_element_type=jnp.float32)
    mu = jax.nn.sigmoid(s)
    diff = r_ref[...] - mu
    sq = jnp.where(c_ref[...] != 0, diff * diff, 0.0)
    # Scalar partial, broadcast into an (8,128)-aligned output tile.
    out_ref[...] = jnp.full(out_ref.shape, jnp.sum(sq), dtype=jnp.float32)


def knowledge_level_forward(w, b, U, neighbor_weights, V, noise, R, C,
                            *, mxu_dtype=jnp.bfloat16):
    """U: (T, L, K, DIM); V: (J, K); R, C: (T, L, J); w: (DIM,); b: (1,); noise: (K,)."""
    T, L, K, _ = U.shape
    J = V.shape[0]
    N = T * L
    f32 = jnp.float32
    hi = jax.lax.Precision.HIGHEST

    # ---- tiny wrapper-side prep (removes 5x U DMA and the (J,J) kernel input) ----
    u_emb = (jnp.einsum('tlkd,d->tlk', U.astype(f32), w.astype(f32), precision=hi)
             + b.astype(f32)[0]).reshape(N, K)
    col = jnp.sum(neighbor_weights.astype(f32), axis=0)               # (J,)
    vj = col[:, None] * V.astype(f32) + noise.astype(f32)[None, :]    # (J, K)

    # ---- tile over N (flattened t*l) ----
    TN = 256 if N >= 256 else _round_up(N, 16)
    N_pad = _round_up(N, TN)
    G = N_pad // TN

    u_p = jnp.zeros((N_pad, K), f32).at[:N].set(u_emb).astype(mxu_dtype)
    r_p = jnp.zeros((N_pad, J), f32).at[:N].set(R.reshape(N, J).astype(f32))
    c_p = jnp.zeros((N_pad, J), jnp.int8).at[:N].set((C == 1).reshape(N, J).astype(jnp.int8))
    vj_c = vj.astype(mxu_dtype)

    # VMEM budget from actual tile sizes (double-buffered inputs), floored at
    # 16 MiB, capped well under v7x's 64 MiB physical VMEM.
    isz = jnp.dtype(mxu_dtype).itemsize
    blk_bytes = TN * K * isz + TN * J * 4 + TN * J * 1 + 8 * 128 * 4
    vmem_limit = int(min(max(4 * blk_bytes + 2 * J * K * isz + (2 << 20), 16 << 20), 56 << 20))

    partials = pl.pallas_call(
        _kl_block_kernel,
        out_shape=jax.ShapeDtypeStruct((G, 8, 128), jnp.float32),
        grid=(G,),
        in_specs=[
            pl.BlockSpec((TN, K), lambda i: (i, 0)),   # U embedding tile
            pl.BlockSpec((J, K), lambda i: (0, 0)),    # V_j (same block every step)
            pl.BlockSpec((TN, J), lambda i: (i, 0)),   # R tile
            pl.BlockSpec((TN, J), lambda i: (i, 0)),   # mask tile (int8)
        ],
        out_specs=pl.BlockSpec((1, 8, 128), lambda i: (i, 0, 0)),
        compiler_params=pltpu.CompilerParams(
            dimension_semantics=("parallel",),         # v7x: both TensorCores
            vmem_limit_bytes=vmem_limit),
    )(u_p, vj_c, r_p, c_p)

    # Fold Gaussian constants / mask count outside the kernel.
    sq_sum = jnp.sum(partials[:, 0, 0])
    count = jnp.sum(C == 1).astype(f32)
    const = -math.log(SIGMA_R) - 0.5 * math.log(2.0 * math.pi)
    return -sq_sum / (2.0 * SIGMA_R * SIGMA_R) + count * const


def _reference(w, b, U, neighbor_weights, V, noise, R, C):
    hi = jax.lax.Precision.HIGHEST
    col = neighbor_weights.sum(axis=0)                     # (J,)
    Vj = col[:, None] * V + noise[None, :]                 # (J, K)
    U_emb = jnp.einsum('tlkd,d->tlk', U, w, precision=hi) + b[0]
    mu = jax.nn.sigmoid(jnp.einsum('tlk,jk->tlj', U_emb, Vj, precision=hi))
    logp = (-((R - mu) ** 2) / (2.0 * SIGMA_R * SIGMA_R)
            - math.log(SIGMA_R) - 0.5 * math.log(2.0 * math.pi))
    return jnp.sum(logp * (C == 1).astype(jnp.float32))


if __name__ == "__main__":
    # Small, module-consistent shapes; num_kc = 128 keeps the contraction lane-dense.
    num_learners, num_topics, num_kc, num_times = 4, 8, 128, 2

    key = jax.random.PRNGKey(0)
    ks = jax.random.split(key, 8)

    # Deterministic "parameters" (shapes from __init__).
    neighbor_weights = jax.random.normal(ks[0], (num_topics, num_topics), jnp.float32)
    w = jax.random.normal(ks[1], (DIM,), jnp.float32) * (1.0 / math.sqrt(DIM))  # Linear(5,1) weight
    b = jax.random.normal(ks[2], (1,), jnp.float32) * 0.1                        # Linear(5,1) bias
    U = jax.random.normal(ks[3], (num_times, num_learners, num_kc, DIM), jnp.float32)

    # Forward inputs (Q is unused by forward()).
    V_in = jax.random.normal(ks[4], (num_topics, num_kc), jnp.float32)
    R = jax.random.uniform(ks[5], (num_times, num_learners, num_topics), jnp.float32)
    C = jax.random.bernoulli(ks[6], 0.5, (num_times, num_learners, num_topics)).astype(jnp.int32)

    # TODO(synk): torch.normal noise drawn inside forward() is passed in as a
    # deterministic input here rather than generated in-kernel.
    noise = SIGMA_V * jax.random.normal(ks[7], (num_kc,), jnp.float32)

    out_bf16 = knowledge_level_forward(w, b, U, neighbor_weights, V_in, noise, R, C,
                                       mxu_dtype=jnp.bfloat16)
    out_f32 = knowledge_level_forward(w, b, U, neighbor_weights, V_in, noise, R, C,
                                      mxu_dtype=jnp.float32)
    out_bf16, out_f32 = jax.block_until_ready((out_bf16, out_f32))

    ref = _reference(w, b, U, neighbor_weights, V_in, noise, R, C)

    # f32 MXU path: should track the f32 reference closely.
    rel_f32 = jnp.abs(out_f32 - ref) / (jnp.abs(ref) + 1e-6)
    assert rel_f32 < 1e-2, (out_f32, ref, rel_f32)
    # bf16 MXU path (perf-review fast path): the Gaussian term amplifies errors by
    # 1/(2*sigma^2)=50 through a saturating sigmoid, so only a coarse check is meaningful.
    rel_bf16 = jnp.abs(out_bf16 - ref) / (jnp.abs(ref) + 1e-6)
    assert rel_bf16 < 5e-2, (out_bf16, ref, rel_bf16)

    print("KERNEL_OK")
</pallas_src>

<mosaic_0001>
module attributes {stable_mosaic.version = 11 : i64} {
  func.func @_kl_block_kernel(%arg0: i32, %arg1: memref<16x128xbf16, #tpu.memory_space<vmem>>, %arg2: memref<8x128xbf16, #tpu.memory_space<vmem>>, %arg3: memref<16x8xf32, #tpu.memory_space<vmem>>, %arg4: memref<16x8xi8, #tpu.memory_space<vmem>>, %arg5: memref<1x8x128xf32, #tpu.memory_space<vmem>>) attributes {dimension_semantics = [#tpu.dimension_semantics<parallel>], iteration_bounds = array<i64: 1>, scalar_prefetch = 0 : i64, scratch_operands = 0 : i64, tpu.core_type = #tpu.core_type<tc>, window_params = [{transform_indices = @transform_0, window_bounds = array<i64: 16, 128>}, {pipeline_mode = #tpu.pipeline_mode<synchronous>, transform_indices = @transform_1, window_bounds = array<i64: 8, 128>}, {transform_indices = @transform_2, window_bounds = array<i64: 16, 8>}, {transform_indices = @transform_3, window_bounds = array<i64: 16, 8>}, {transform_indices = @transform_4, window_bounds = array<i64: 1, 8, 128>}]} {
    %c0 = arith.constant 0 : index
    %c0_0 = arith.constant 0 : index
    %0 = vector.load %arg1[%c0, %c0_0] : memref<16x128xbf16, #tpu.memory_space<vmem>>, vector<16x128xbf16>
    %c0_1 = arith.constant 0 : index
    %c0_2 = arith.constant 0 : index
    %1 = vector.load %arg2[%c0_1, %c0_2] : memref<8x128xbf16, #tpu.memory_space<vmem>>, vector<8x128xbf16>
    %cst = arith.constant dense<0.000000e+00> : vector<16x8xf32>
    %2 = tpu.matmul %0, %1, %cst {dimension_numbers = #tpu.dot_dimension_numbers<[1], [1], [0], [0], [0, 0, 1, 0], [], []>} : vector<16x128xbf16>, vector<8x128xbf16>, vector<16x8xf32> -> vector<16x8xf32>
    %3 = arith.negf %2 : vector<16x8xf32>
    %4 = math.exp %3 : vector<16x8xf32>
    %cst_3 = arith.constant 1.000000e+00 : f32
    %5 = vector.broadcast %cst_3 : f32 to vector<16x8xf32>
    %6 = arith.addf %5, %4 : vector<16x8xf32>
    %7 = arith.divf %5, %6 : vector<16x8xf32>
    %c0_4 = arith.constant 0 : index
    %c0_5 = arith.constant 0 : index
    %8 = vector.load %arg3[%c0_4, %c0_5] : memref<16x8xf32, #tpu.memory_space<vmem>>, vector<16x8xf32>
    %9 = arith.subf %8, %7 : vector<16x8xf32>
    %c0_6 = arith.constant 0 : index
    %c0_7 = arith.constant 0 : index
    %10 = vector.load %arg4[%c0_6, %c0_7] : memref<16x8xi8, #tpu.memory_space<vmem>>, vector<16x8xi8>
    %c0_i8 = arith.constant 0 : i8
    %11 = vector.broadcast %c0_i8 : i8 to vector<16x8xi8>
    %12 = arith.cmpi ne, %10, %11 : vector<16x8xi8>
    %13 = arith.mulf %9, %9 : vector<16x8xf32>
    %cst_8 = arith.constant 0.000000e+00 : f32
    %14 = vector.broadcast %cst_8 : f32 to vector<16x8xf32>
    %15 = arith.select %12, %13, %14 : vector<16x8xi1>, vector<16x8xf32>
    %16 = vector.shape_cast %15 : vector<16x8xf32> to vector<1x16x8xf32>
    %cst_9 = arith.constant dense<0.000000e+00> : vector<1xf32>
    %17 = vector.multi_reduction <add>, %16, %cst_9 [1, 2] : vector<1x16x8xf32> to vector<1xf32>
    %18 = vector.shape_cast %17 : vector<1xf32> to vector<1x1x1xf32>
    %19 = vector.extract %18[0, 0, 0] : f32 from vector<1x1x1xf32>
    %20 = vector.broadcast %19 : f32 to vector<1x8x128xf32>
    %c0_10 = arith.constant 0 : index
    %c0_11 = arith.constant 0 : index
    %c0_12 = arith.constant 0 : index
    %21 = vector.load %arg5[%c0_10, %c0_11, %c0_12] : memref<1x8x128xf32, #tpu.memory_space<vmem>>, vector<1x8x128xf32>
    tpu.vector_store %arg5[%c0_10, %c0_11, %c0_12], %20 {strides = array<i32>} : memref<1x8x128xf32, #tpu.memory_space<vmem>>, vector<1x8x128xf32>,
    return
  }
  func.func @transform_0(%arg0: i32) -> (i32, i32) {
    %c0_i32 = arith.constant 0 : i32
    %c0_i32_0 = arith.constant 0 : i32
    return %arg0, %c0_i32 : i32, i32
  }
  func.func @transform_1(%arg0: i32) -> (i32, i32) {
    %c0_i32 = arith.constant 0 : i32
    %c0_i32_0 = arith.constant 0 : i32
    %c0_i32_1 = arith.constant 0 : i32
    return %c0_i32, %c0_i32_0 : i32, i32
  }
  func.func @transform_2(%arg0: i32) -> (i32, i32) {
    %c0_i32 = arith.constant 0 : i32
    %c0_i32_0 = arith.constant 0 : i32
    return %arg0, %c0_i32 : i32, i32
  }
  func.func @transform_3(%arg0: i32) -> (i32, i32) {
    %c0_i32 = arith.constant 0 : i32
    %c0_i32_0 = arith.constant 0 : i32
    return %arg0, %c0_i32 : i32, i32
  }
  func.func @transform_4(%arg0: i32) -> (i32, i32, i32) {
    %c0_i32 = arith.constant 0 : i32
    %c0_i32_0 = arith.constant 0 : i32
    %c0_i32_1 = arith.constant 0 : i32
    return %arg0, %c0_i32, %c0_i32_0 : i32, i32, i32
  }
}

</mosaic_0001>

<bundles_post_ra>
// kernel: tpu_custom_call.1
= control target key start
LH: loop header
LB: loop body
LE: loop exit
PB: predicated region body
PF: predicated region fallthrough
CT: control target
= control target key end

     0   :  { %s224_s0 = inlined_call_operand.vmem [shape: bf16[16,128], index: 0, kind: input, shape index: {}]   ;;  %s225_s1 = inlined_call_operand.vmem [shape: bf16[8,128], index: 1, kind: input, shape index: {}]   ;;  %s226_s2 = inlined_call_operand.vmem [shape: f32[16,8], index: 2, kind: input, shape index: {}]   ;;  %s227_s3 = inlined_call_operand.vmem [shape: s8[16,8], index: 3, kind: input, shape index: {}]   ;;  %s228_s4 = inlined_call_operand.hbm [shape: f32[1,8,128], index: 4, kind: output, shape index: {}]  }
   0x1   :  { %v23_v0 = vld [vmem:[%s225_s1] sm:$0xf] }
   0x2   :  { %9 = vsyncpa [#allocation3], 0  ;;  %37 = vmatpush.bf16.xpose.msra.mxu0 %v23_v0  ;;  %v137_v1 = vld [vmem:[%s224_s0] sm:$0xff]  ;;  %v176_v26 = vmov 0   ;;  %v83_v36 = vld [vmem:[%s226_s2 + $0x8] sm:$0xff]  ;;  %vm100_vm12 = vcmask 64512  }
   0x3   :  { %v86_v16 = vld [vmem:[%s227_s3] sm:$0x3]  ;;  %v87_v17 = vld [vmem:[%s227_s3 + $0x2] sm:$0x3]  ;;  %s122_s27 = sshll.u32 %s228_s4, 4  ;;  %s123_s27 = int_to_ptr.hbm [resolvable:$true] %s122_s27 }
   0x4   :  { %vm88_vm3 = vnez %v86_v16  ;;  %vm89_vm5 = vnez %v87_v17  ;;  %v82_v24 = vld [vmem:[%s226_s2] sm:$0xff]  ;;  %s177_s2 = smov [#allocation2]  }
   0x5   :  { %v92_v27 = vsel %vm88_vm3, 16843009, %v176_v26  ;;  %v93_v29 = vsel %vm89_vm5, 16843009, %v176_v26  ;;  %s120_s24 = sshll.u32 %s177_s2, 4  ;;  %s121_s24 = int_to_ptr.vmem [resolvable:$true] %s120_s24 }
   0x6   :  { %v94_v33 = vunpack.c.0.s8 %v92_v27  ;;  %v95_v37 = vunpack.c.0.s8 %v93_v29 }
   0x8   :  { %vm96_vm10 = vcmp.ne.s32.totalorder %v94_v33, 0  ;;  %vm97_vm11 = vcmp.ne.s32.totalorder %v95_v37, 0 }
   0x9   :  { %38 = vmatmul.bf16.vlgmr.msra.gmra.mxu0 %v137_v1 }
  0x86   :  { %v39_v2 = vpop.f32.mrf.mxu0 }
  0x87   :  { %v135_v3 = vmul.f32 -1.442695, %v39_v2 }
  0x89   :  { %142 = vpow2.f32 %v135_v3 }
  0x8e   :  { %v41_v4 = vpop.f32.mrf.mxu0 }
  0x8f   :  { %v143_v5 = vpop.eup %142  ;;  %v136_v6 = vmul.f32 -1.442695, %v41_v4 }
  0x90   :  { %v50_v7 = vadd.f32 1.0, %v143_v5 }
  0x91   :  { %144 = vpow2.f32 %v136_v6 }
  0x92   :  { %146 = vrcp.f32 %v50_v7  ;;  %v63_v13 = vand.u32 2147483648, %v50_v7  ;;  %v61_v15 = vand.u32 2147483647, %v50_v7  ;;  %vm57_vm1 = vweird.f32 %v50_v7 }
  0x94   :  { %v64_v20 = vor.u32 1.1754944e-38, %v63_v13  ;;  %vm62_vm4 = vcmp.eq.f32.partialorder %v61_v15, 8.507059e+37 }
  0x97   :  { %v145_v8 = vpop.eup %144 }
  0x98   :  { %v147_v9 = vpop.eup %146  ;;  %v51_v10 = vadd.f32 1.0, %v145_v8 }
  0x99   :  { %v53_v11 = vmul.f32 %v147_v9, %v50_v7  ;;  %vm58_vm0 = vweird.f32 %v147_v9 }
  0x9a   :  { %148 = vrcp.f32 %v51_v10  ;;  %vm59_vm2 = vmor %vm57_vm1, %vm58_vm0  ;;  %v78_v28 = vand.u32 2147483648, %v51_v10  ;;  %v76_v31 = vand.u32 2147483647, %v51_v10  ;;  %vm72_vm7 = vweird.f32 %v51_v10 }
  0x9b   :  { %v54_v12 = vsub.f32 1.0, %v53_v11 }
  0x9c   :  { %v79_v35 = vor.u32 1.1754944e-38, %v78_v28  ;;  %vm77_vm9 = vcmp.eq.f32.partialorder %v76_v31, 8.507059e+37 }
  0x9d   :  { %v55_v14 = vmul.f32 %v147_v9, %v54_v12 }
  0x9f   :  { %v56_v18 = vadd.f32 %v147_v9, %v55_v14 }
  0xa0   :  { %v149_v19 = vpop.eup %148 }
  0xa1   :  { %v68_v21 = vmul.f32 %v149_v19, %v51_v10  ;;  %v60_v22 = vsel %vm59_vm2, %v147_v9, %v56_v18  ;;  %vm73_vm6 = vweird.f32 %v149_v19 }
  0xa2   :  { %v65_v23 = vsel %vm62_vm4, %v64_v20, %v60_v22  ;;  %vm74_vm8 = vmor %vm72_vm7, %vm73_vm6 }
  0xa3   :  { %v69_v25 = vsub.f32 1.0, %v68_v21  ;;  %v84_v32 = vsub.f32 %v82_v24, %v65_v23 }
  0xa5   :  { %v70_v30 = vmul.f32 %v149_v19, %v69_v25  ;;  %v90_v39 = vmul.f32 %v84_v32, %v84_v32 }
  0xa7   :  { %v71_v34 = vadd.f32 %v149_v19, %v70_v30  ;;  %v98_v43 = vsel %vm96_vm10, %v90_v39, 0.0 }
  0xa8   :  { %v101_v45 = vsel %vm100_vm12, %v98_v43, 0.0 }
  0xa9   :  { %v75_v38 = vsel %vm74_vm8, %v149_v19, %v71_v34 }
  0xaa   :  { %v80_v40 = vsel %vm77_vm9, %v79_v35, %v75_v38 }
  0xab   :  { %v85_v41 = vsub.f32 %v83_v36, %v80_v40 }
  0xad   :  { %v91_v42 = vmul.f32 %v85_v41, %v85_v41 }
  0xaf   :  { %v99_v44 = vsel %vm97_vm11, %v91_v42, 0.0 }
  0xb0   :  { %v102_v46 = vsel %vm100_vm12, %v99_v44, 0.0 }
  0xb1   :  { %v103_v47 = vadd.f32 %v102_v46, %v101_v45 }
  0xb3   :  { %104 = vadd.xlane.f32.xlu0 %v103_v47 }
 0x126   :  { %v105_v48 = vpop.xlane.xlu0 %104 }
 0x127   :  { %v106_v49 = vrot.slane %v105_v48, 4 }
 0x129   :  { %v107_v50 = vadd.f32 %v106_v49, %v105_v48 }
 0x12b   :  { %v108_v51 = vrot.slane %v107_v50, 2 }
 0x12d   :  { %v109_v52 = vadd.f32 %v108_v51, %v107_v50 }
 0x12f   :  { %v110_v53 = vrot.slane %v109_v52, 1 }
 0x131   :  { %v111_v54 = vadd.f32 %v110_v53, %v109_v52 }
 0x133   :  { %138 = vpush %v111_v54 }
 0x164   :  { %s139_s28 = spop %138 }
 0x165   :  { %v113_v55 = vstv %s139_s28 }
 0x166   :  { %114 = vst [vmem:[#allocation2] sm:$0xff] %v113_v55 }
 0x167   :  { %125 = dma.vmem_to_hbm [thread:$0]  %s121_s24, 128, %s123_s27, [#allocation3]  }
 0x168   :  { %174 = dma.done.wait [#allocation3], 128  }
 0x169   :  { %175 = vsyncadd [#allocation3], 4294967168 }
 0x16a   :  { %130 = vsyncpa [#allocation3], 1 }

</bundles_post_ra>
